<compile_context>
chip_gen: v6e
topology: v6e:2x2x1
jax: 0.10.0
libtpu: 0.0.40
codegen_flags: <defaults>
</compile_context>

<pallas_src>
import jax
import jax.numpy as jnp
from jax import lax
from jax.experimental import pallas as pl
from jax.experimental.pallas import tpu as pltpu

HARDTANH_MIN = 0.0
HARDTANH_MAX = 20.0


def _round_up(x: int, m: int) -> int:
    return ((x + m - 1) // m) * m


def _conv_out_len(length: int, pad: int, ksize: int, stride: int) -> int:
    return (length + 2 * pad - (ksize - 1) - 1) // stride + 1


def _conv_hardtanh_mask_kernel(a_ref, w_ref, keep_ref, o_ref):
    """One row-tile of fused Conv2d(im2col matmul) -> Hardtanh(0,20) -> mask.

    a_ref:    (tm, K)      bf16 im2col patches, rows = flattened (b, h_out, t_out)
    w_ref:    (K, C_out)   bf16 weight (whole, weight-stationary)
    keep_ref: (tm, 1)      f32 1.0/0.0 row mask: 1 iff t_out < seq_len_out[b]
    o_ref:    (tm, C_out)  bf16 output
    """
    acc = jnp.dot(a_ref[...], w_ref[...], preferred_element_type=jnp.float32)
    # Hardtanh(0, 20) on the VPU, fused into the matmul epilogue.
    acc = jnp.minimum(jnp.maximum(acc, HARDTANH_MIN), HARDTANH_MAX)
    # MaskConv2d time masking.  Reference order is mask->clamp->mask; because
    # HARDTANH_MIN == 0 (clamp(0) == 0) a single multiply after the clamp is
    # exactly equivalent and produces exact zeros.
    acc = acc * keep_ref[...]
    o_ref[...] = acc.astype(o_ref.dtype)


def masked_conv2d_layer(x_nhwc, w, seq_lens, *, stride, padding, tm=1024):
    """One MaskConv2d block: Conv2d(bias=False) -> Hardtanh(0, 20) -> time mask.

    x_nhwc:   (B, H, T, C_in)  bfloat16, channels-last
    w:        (C_out, C_in, kh, kw) float32 (PyTorch OIHW layout)
    seq_lens: (B,) int32 valid lengths along T
    Returns (y_nhwc, seq_out), y_nhwc: (B, H_out, T_out, C_out) bfloat16.
    """
    B, H, T, C_in = x_nhwc.shape
    C_out, _, kh, kw = w.shape
    sh, sw = stride
    ph, pw = padding

    H_out = _conv_out_len(H, ph, kh, sh)
    T_out = _conv_out_len(T, pw, kw, sw)
    M = H_out * T_out           # output positions per batch element
    K = C_in * kh * kw          # im2col depth (kept whole: conv frontends are small-K)
    R = B * M                   # total output rows (batch folded into M)

    # _get_sequence_lengths, Conv2d branch (vectorized integer arithmetic).
    seq_out = ((seq_lens.astype(jnp.int32) + 2 * pw - (kw - 1) - 1) // sw
               + 1).astype(jnp.int32)

    # Channels-last im2col: (B, H_out, T_out, C_in*kh*kw) with feature order
    # (C_in, kh, kw) -- matches w.reshape(C_out, C_in*kh*kw).  The reshape to
    # (R, K) is layout-free: no HBM transpose, no K zero-padding.
    patches = lax.conv_general_dilated_patches(
        x_nhwc, filter_shape=(kh, kw), window_strides=(sh, sw),
        padding=((ph, ph), (pw, pw)),
        dimension_numbers=("NHWC", "HWIO", "NHWC"))
    patches = patches.reshape(R, K)

    w2d = w.reshape(C_out, K).T.astype(x_nhwc.dtype)          # (K, C_out) bf16

    # Per-row keep mask (1.0 / 0.0) precomputed in XLA, so the kernel epilogue
    # is a single broadcast multiply (no modulo, no scalar prefetch, no
    # program_id).  Row layout (b major, h_out, t_out minor) must stay coupled
    # with the (B, H_out, T_out, C_out) reshape of the output below.
    t_idx = jnp.broadcast_to(jnp.arange(T_out, dtype=jnp.int32)[None, :],
                             (H_out, T_out)).reshape(M)       # == m % T_out
    keep = (t_idx[None, :] < seq_out[:, None]).astype(jnp.float32)   # (B, M)
    keep = keep.reshape(R, 1)

    tm_eff = max(8, min(tm, _round_up(R, 8)))
    grid = (pl.cdiv(R, tm_eff),)   # ragged last tile is edge-masked by Pallas

    out = pl.pallas_call(
        _conv_hardtanh_mask_kernel,
        out_shape=jax.ShapeDtypeStruct((R, C_out), x_nhwc.dtype),
        grid=grid,
        in_specs=[
            pl.BlockSpec((tm_eff, K), lambda i: (i, 0)),      # contiguous patch tile
            pl.BlockSpec((K, C_out), lambda i: (0, 0)),       # whole weight (stationary)
            pl.BlockSpec((tm_eff, 1), lambda i: (i, 0)),      # row keep mask
        ],
        out_specs=pl.BlockSpec((tm_eff, C_out), lambda i: (i, 0)),
        compiler_params=pltpu.CompilerParams(
            dimension_semantics=("parallel",)),
    )(patches, w2d, keep)

    y = out.reshape(B, H_out, T_out, C_out)    # free reshape, feeds next layer
    return y, seq_out


class MaskConv2dPallas:
    """Pallas analogue of MaskConv2d over Conv2d(bias=False)+Hardtanh blocks.

    Internally runs channels-last (B, H, T, C) in bfloat16 so every layer's
    im2col patches land directly in (rows, K) layout and each output feeds the
    next layer without any relayout; converts back to the module's
    (B, C, H, T) float32 interface only at the stack boundary.
    """

    def __init__(self, layers):
        # layers: list of dicts {"weight": (C_out,C_in,kh,kw) f32,
        #                        "stride": (sh,sw), "padding": (ph,pw)}
        self.layers = layers

    def __call__(self, x, seq_lens):
        h = jnp.transpose(x, (0, 2, 3, 1)).astype(jnp.bfloat16)   # NCHW -> NHWC
        for layer in self.layers:
            h, seq_lens = masked_conv2d_layer(
                h, layer["weight"], seq_lens,
                stride=layer["stride"], padding=layer["padding"])
        y = jnp.transpose(h, (0, 3, 1, 2)).astype(x.dtype)        # NHWC -> NCHW
        return y, seq_lens


# -----------------------------------------------------------------------------
# Pure-JAX reference replicating the PyTorch MaskConv2d semantics exactly
# (NCHW, f32, HIGHEST-precision conv, mask -> Hardtanh -> mask).
# -----------------------------------------------------------------------------
def _reference_layer(x, w, seq_lens, stride, padding):
    sh, sw = stride
    ph, pw = padding
    kw = w.shape[3]
    y = lax.conv_general_dilated(
        x, w, window_strides=(sh, sw),
        padding=((ph, ph), (pw, pw)),
        dimension_numbers=("NCHW", "OIHW", "NCHW"),
        precision=lax.Precision.HIGHEST)
    seq_out = ((seq_lens.astype(jnp.int32) + 2 * pw - (kw - 1) - 1) // sw
               + 1).astype(jnp.int32)
    t = jnp.arange(y.shape[3])
    keep = (t[None, :] < seq_out[:, None])[:, None, None, :]
    y = jnp.where(keep, y, 0.0)                   # mask after Conv2d
    y = jnp.clip(y, HARDTANH_MIN, HARDTANH_MAX)   # Hardtanh(0, 20)
    y = jnp.where(keep, y, 0.0)                   # mask after Hardtanh
    return y, seq_out


if __name__ == "__main__":
    key = jax.random.PRNGKey(0)
    k_x, k_w1, k_w2 = jax.random.split(key, 3)

    # (B, C, H, T) spectrogram-like input with ragged valid lengths along T.
    B, C_in, H, T = 2, 1, 16, 16
    x = jax.random.normal(k_x, (B, C_in, H, T), dtype=jnp.float32)
    seq_lens = jnp.array([16, 9], dtype=jnp.int32)

    layers = [
        dict(weight=0.5 * jax.random.normal(k_w1, (4, C_in, 3, 3),
                                            dtype=jnp.float32),
             stride=(2, 2), padding=(1, 1)),
        dict(weight=0.5 * jax.random.normal(k_w2, (8, 4, 3, 3),
                                            dtype=jnp.float32),
             stride=(1, 1), padding=(1, 1)),
    ]

    model = MaskConv2dPallas(layers)
    fwd = jax.jit(lambda a, s: model(a, s))
    y, seq_out = fwd(x, seq_lens)
    y = jax.block_until_ready(y)

    # Reference path, evaluated at the same bf16 input/weight precision the
    # kernel uses (the Pallas path additionally keeps inter-layer activations
    # in bf16, which the tolerance below covers).
    x_q = x.astype(jnp.bfloat16).astype(jnp.float32)
    y_ref, seq_ref = x_q, seq_lens
    for layer in layers:
        w_q = layer["weight"].astype(jnp.bfloat16).astype(jnp.float32)
        y_ref, seq_ref = _reference_layer(y_ref, w_q, seq_ref,
                                          layer["stride"], layer["padding"])

    assert y.shape == y_ref.shape and y.dtype == x.dtype
    assert jnp.array_equal(seq_out, seq_ref), (seq_out, seq_ref)
    max_err = float(jnp.max(jnp.abs(y - y_ref)))
    assert jnp.allclose(y, y_ref, atol=5e-2, rtol=5e-2), max_err
    # Masked time steps must be exactly zero.
    t_idx = jnp.arange(y.shape[3])
    padded = (t_idx[None, :] >= seq_out[:, None])[:, None, None, :]
    assert bool(jnp.all(jnp.where(padded, y, 0.0) == 0.0))

    print("KERNEL_OK")
</pallas_src>

<mosaic_0001>
module attributes {stable_mosaic.version = 11 : i64} {
  func.func @_conv_hardtanh_mask_kernel(%arg0: i32, %arg1: memref<128x9xbf16, #tpu.memory_space<vmem>>, %arg2: memref<9x4xbf16, #tpu.memory_space<vmem>>, %arg3: memref<128x1xf32, #tpu.memory_space<vmem>>, %arg4: memref<128x4xbf16, #tpu.memory_space<vmem>>) attributes {dimension_semantics = [#tpu.dimension_semantics<parallel>], iteration_bounds = array<i64: 1>, scalar_prefetch = 0 : i64, scratch_operands = 0 : i64, tpu.core_type = #tpu.core_type<tc>, window_params = [{transform_indices = @transform_0, window_bounds = array<i64: 128, 9>}, {pipeline_mode = #tpu.pipeline_mode<synchronous>, transform_indices = @transform_1, window_bounds = array<i64: 9, 4>}, {transform_indices = @transform_2, window_bounds = array<i64: 128, 1>}, {transform_indices = @transform_3, window_bounds = array<i64: 128, 4>}]} {
    %c0 = arith.constant 0 : index
    %c0_0 = arith.constant 0 : index
    %0 = vector.load %arg1[%c0, %c0_0] : memref<128x9xbf16, #tpu.memory_space<vmem>>, vector<128x9xbf16>
    %c0_1 = arith.constant 0 : index
    %c0_2 = arith.constant 0 : index
    %1 = vector.load %arg2[%c0_1, %c0_2] : memref<9x4xbf16, #tpu.memory_space<vmem>>, vector<9x4xbf16>
    %cst = arith.constant dense<0.000000e+00> : vector<128x4xf32>
    %2 = tpu.matmul %0, %1, %cst {dimension_numbers = #tpu.dot_dimension_numbers<[1], [0], [0], [1], [0, 0, 1, 1], [], []>} : vector<128x9xbf16>, vector<9x4xbf16>, vector<128x4xf32> -> vector<128x4xf32>
    %cst_3 = arith.constant 0.000000e+00 : f32
    %3 = vector.broadcast %cst_3 : f32 to vector<128x4xf32>
    %4 = arith.maximumf %2, %3 : vector<128x4xf32>
    %cst_4 = arith.constant 2.000000e+01 : f32
    %5 = vector.broadcast %cst_4 : f32 to vector<128x4xf32>
    %6 = arith.minimumf %4, %5 : vector<128x4xf32>
    %c0_5 = arith.constant 0 : index
    %c0_6 = arith.constant 0 : index
    %7 = vector.load %arg3[%c0_5, %c0_6] : memref<128x1xf32, #tpu.memory_space<vmem>>, vector<128x1xf32>
    %8 = vector.broadcast %7 : vector<128x1xf32> to vector<128x4xf32>
    %9 = arith.mulf %6, %8 : vector<128x4xf32>
    %10 = arith.truncf %9 : vector<128x4xf32> to vector<128x4xbf16>
    %c0_7 = arith.constant 0 : index
    %c0_8 = arith.constant 0 : index
    %11 = vector.load %arg4[%c0_7, %c0_8] : memref<128x4xbf16, #tpu.memory_space<vmem>>, vector<128x4xbf16>
    tpu.vector_store %arg4[%c0_7, %c0_8], %10 {strides = array<i32>} : memref<128x4xbf16, #tpu.memory_space<vmem>>, vector<128x4xbf16>,
    return
  }
  func.func @transform_0(%arg0: i32) -> (i32, i32) {
    %c0_i32 = arith.constant 0 : i32
    %c0_i32_0 = arith.constant 0 : i32
    return %arg0, %c0_i32 : i32, i32
  }
  func.func @transform_1(%arg0: i32) -> (i32, i32) {
    %c0_i32 = arith.constant 0 : i32
    %c0_i32_0 = arith.constant 0 : i32
    %c0_i32_1 = arith.constant 0 : i32
    return %c0_i32, %c0_i32_0 : i32, i32
  }
  func.func @transform_2(%arg0: i32) -> (i32, i32) {
    %c0_i32 = arith.constant 0 : i32
    %c0_i32_0 = arith.constant 0 : i32
    return %arg0, %c0_i32 : i32, i32
  }
  func.func @transform_3(%arg0: i32) -> (i32, i32) {
    %c0_i32 = arith.constant 0 : i32
    %c0_i32_0 = arith.constant 0 : i32
    return %arg0, %c0_i32 : i32, i32
  }
}

module attributes {stable_mosaic.version = 11 : i64} {
  func.func @_conv_hardtanh_mask_kernel(%arg0: i32, %arg1: memref<128x36xbf16, #tpu.memory_space<vmem>>, %arg2: memref<36x8xbf16, #tpu.memory_space<vmem>>, %arg3: memref<128x1xf32, #tpu.memory_space<vmem>>, %arg4: memref<128x8xbf16, #tpu.memory_space<vmem>>) attributes {dimension_semantics = [#tpu.dimension_semantics<parallel>], iteration_bounds = array<i64: 1>, scalar_prefetch = 0 : i64, scratch_operands = 0 : i64, tpu.core_type = #tpu.core_type<tc>, window_params = [{transform_indices = @transform_0, window_bounds = array<i64: 128, 36>}, {pipeline_mode = #tpu.pipeline_mode<synchronous>, transform_indices = @transform_1, window_bounds = array<i64: 36, 8>}, {transform_indices = @transform_2, window_bounds = array<i64: 128, 1>}, {transform_indices = @transform_3, window_bounds = array<i64: 128, 8>}]} {
    %c0 = arith.constant 0 : index
    %c0_0 = arith.constant 0 : index
    %0 = vector.load %arg1[%c0, %c0_0] : memref<128x36xbf16, #tpu.memory_space<vmem>>, vector<128x36xbf16>
    %c0_1 = arith.constant 0 : index
    %c0_2 = arith.constant 0 : index
    %1 = vector.load %arg2[%c0_1, %c0_2] : memref<36x8xbf16, #tpu.memory_space<vmem>>, vector<36x8xbf16>
    %cst = arith.constant dense<0.000000e+00> : vector<128x8xf32>
    %2 = tpu.matmul %0, %1, %cst {dimension_numbers = #tpu.dot_dimension_numbers<[1], [0], [0], [1], [0, 0, 1, 1], [], []>} : vector<128x36xbf16>, vector<36x8xbf16>, vector<128x8xf32> -> vector<128x8xf32>
    %cst_3 = arith.constant 0.000000e+00 : f32
    %3 = vector.broadcast %cst_3 : f32 to vector<128x8xf32>
    %4 = arith.maximumf %2, %3 : vector<128x8xf32>
    %cst_4 = arith.constant 2.000000e+01 : f32
    %5 = vector.broadcast %cst_4 : f32 to vector<128x8xf32>
    %6 = arith.minimumf %4, %5 : vector<128x8xf32>
    %c0_5 = arith.constant 0 : index
    %c0_6 = arith.constant 0 : index
    %7 = vector.load %arg3[%c0_5, %c0_6] : memref<128x1xf32, #tpu.memory_space<vmem>>, vector<128x1xf32>
    %8 = vector.broadcast %7 : vector<128x1xf32> to vector<128x8xf32>
    %9 = arith.mulf %6, %8 : vector<128x8xf32>
    %10 = arith.truncf %9 : vector<128x8xf32> to vector<128x8xbf16>
    %c0_7 = arith.constant 0 : index
    %c0_8 = arith.constant 0 : index
    %11 = vector.load %arg4[%c0_7, %c0_8] : memref<128x8xbf16, #tpu.memory_space<vmem>>, vector<128x8xbf16>
    tpu.vector_store %arg4[%c0_7, %c0_8], %10 {strides = array<i32>} : memref<128x8xbf16, #tpu.memory_space<vmem>>, vector<128x8xbf16>,
    return
  }
  func.func @transform_0(%arg0: i32) -> (i32, i32) {
    %c0_i32 = arith.constant 0 : i32
    %c0_i32_0 = arith.constant 0 : i32
    return %arg0, %c0_i32 : i32, i32
  }
  func.func @transform_1(%arg0: i32) -> (i32, i32) {
    %c0_i32 = arith.constant 0 : i32
    %c0_i32_0 = arith.constant 0 : i32
    %c0_i32_1 = arith.constant 0 : i32
    return %c0_i32, %c0_i32_0 : i32, i32
  }
  func.func @transform_2(%arg0: i32) -> (i32, i32) {
    %c0_i32 = arith.constant 0 : i32
    %c0_i32_0 = arith.constant 0 : i32
    return %arg0, %c0_i32 : i32, i32
  }
  func.func @transform_3(%arg0: i32) -> (i32, i32) {
    %c0_i32 = arith.constant 0 : i32
    %c0_i32_0 = arith.constant 0 : i32
    return %arg0, %c0_i32 : i32, i32
  }
}

</mosaic_0001>

<bundles_post_ra>
// kernel: lt.15
= control target key start
LH: loop header
LB: loop body
LE: loop exit
PB: predicated region body
PF: predicated region fallthrough
CT: control target
= control target key end

     0   :  { %s69_s10 = smov 56   ;;  %s70_s11 = smov 40   ;;  %vm3_vm0 = vcmask 64512   ;;  %vm9_vm1 = vcmask 523712   ;;  %vm15_vm2 = vcmask 458112   ;;  %vm21_vm3 = vcmask 392512   ;;  %s113_s0 = inlined_call_operand.vmem [shape: s32[8,8], index: 0, kind: input, shape index: {}]   ;;  %s114_s1 = inlined_call_operand.vmem [shape: s32[64], index: 1, kind: output, shape index: {}]  }
   0x1   :  { %v55_v0 = vld [vmem:[%s113_s0 + $0x7] sm:$0x1]   ;;  %v57_v1 = vld [vmem:[%s113_s0 + $0x5] sm:$0x1]   ;;  %v56_v2 = vld [vmem:[%s113_s0 + $0x6] sm:$0x1]  }
   0x2   :  { %7 = vrot.lane.b32.xlu0 %v55_v0, %s69_s10  ;;  %19 = vrot.lane.b32.xlu1 %v57_v1, %s70_s11  ;;  %v58_v3 = vld [vmem:[%s113_s0 + $0x4] sm:$0x1]   ;;  %v2_v4 = vld [vmem:[%s113_s0] sm:$0x1]   ;;  %s71_s18 = smov 48   ;;  %s72_s19 = smov 32  }
   0x3   :  { %4 = vst.msk [vmem:[#allocation0] sm:$0x1] %vm3_vm0, %v2_v4   ;;  %v59_v5 = vld [vmem:[%s113_s0 + $0x3] sm:$0x1]   ;;  %v60_v6 = vld [vmem:[%s113_s0 + $0x2] sm:$0x1]  }
   0x4   :  { %s73_s24 = smov 24   ;;  %s74_s25 = smov 16   ;;  %v61_v7 = vld [vmem:[%s113_s0 + $0x1] sm:$0x1]   ;;  %vm27_vm4 = vcmask 326912   ;;  %vm33_vm5 = vcmask 261312  }
   0x5   :  { %s75_s0 = smov 8   ;;  %vm39_vm6 = vcmask 195712   ;;  %vm45_vm7 = vcmask 130112  }
   0x6   :  { %13 = vrot.lane.b32.xlu0 %v56_v2, %s71_s18  ;;  %25 = vrot.lane.b32.xlu1 %v58_v3, %s72_s19 }
   0xa   :  { %31 = vrot.lane.b32.xlu0 %v59_v5, %s73_s24  ;;  %37 = vrot.lane.b32.xlu1 %v60_v6, %s74_s25 }
   0xe   :  { %43 = vrot.lane.b32.xlu0 %v61_v7, %s75_s0 }
  0x74   :  { %v8_v8 = vpop.permute.xlu0 %7   ;;  %v20_v9 = vpop.permute.xlu1 %19  }
  0x75   :  { %10 = vst.msk [vmem:[#allocation0] sm:$0x1] %vm9_vm1, %v8_v8  }
  0x78   :  { %v14_v10 = vpop.permute.xlu0 %13   ;;  %v26_v11 = vpop.permute.xlu1 %25  }
  0x79   :  { %16 = vst.msk [vmem:[#allocation0] sm:$0x1] %vm15_vm2, %v14_v10  }
  0x7a   :  { %22 = vst.msk [vmem:[#allocation0] sm:$0x1] %vm21_vm3, %v20_v9  }
  0x7b   :  { %28 = vst.msk [vmem:[#allocation0] sm:$0x1] %vm27_vm4, %v26_v11  }
  0x7c   :  { %v32_v12 = vpop.permute.xlu0 %31   ;;  %v38_v13 = vpop.permute.xlu1 %37  }
  0x7d   :  { %34 = vst.msk [vmem:[#allocation0] sm:$0x1] %vm33_vm5, %v32_v12  }
  0x7e   :  { %40 = vst.msk [vmem:[#allocation0] sm:$0x1] %vm39_vm6, %v38_v13  }
  0x80   :  { %v44_v14 = vpop.permute.xlu0 %43  }
  0x81   :  { %46 = vst.msk [vmem:[#allocation0] sm:$0x1] %vm45_vm7, %v44_v14  }
  0x88   :  { %v51_v15 = vld [vmem:[#allocation0] sm:$0x1] }
  0x89   :  { %54 = vst [vmem:[%s114_s1] sm:$0x1] %v51_v15 }

// kernel: _lambda_.3
= control target key start
LH: loop header
LB: loop body
LE: loop exit
PB: predicated region body
PF: predicated region fallthrough
CT: control target
= control target key end

     0   :  { %vm116_vm0 = vcmask 1041408   ;;  %vm91_vm1 = vcmask 293888   ;;  %v552_v2 = vmov 0   ;;  %vm425_vm2 = vcmask 60416   ;;  %s741_s1 = inlined_call_operand.vmem [shape: bf16[36,8], index: 1, kind: input, shape index: {}]   ;;  %s742_s0 = inlined_call_operand.vmem [shape: bf16[128,36], index: 0, kind: input, shape index: {}]   ;;  %s743_s2 = inlined_call_operand.vmem [shape: f32[128,1], index: 2, kind: input, shape index: {}]   ;;  %s744_s3 = inlined_call_operand.vmem [shape: bf16[128,8], index: 3, kind: output, shape index: {}]  }
   0x1   :  { %v541_v0 = vld [vmem:[%s741_s1 + $0x10] ss:$0 sps:$4 sm:$0x33]   ;;  %v542_v1 = vld [vmem:[%s741_s1 + $0x8] sm:$0xff]   ;;  %540 = vset.pattern.permute.xlu1 %v552_v2  ;;  %539 = vset.pattern.permute.xlu0 %v552_v2  ;;  %v543_v4 = vld [vmem:[%s741_s1] sm:$0xff]  }
   0x2   :  { %536 = vmatprep.subr.msk.bf16.mxu0 %vm116_vm0, %v541_v0  ;;  %537 = vmatprep.subr.msk.bf16.mxu1 %vm116_vm0, %v541_v0  ;;  %v118_v3 = vsel %vm116_vm0, %v541_v0, 0  ;;  %v544_v5 = vld [vmem:[%s742_s0] sm:$0xff]   ;;  %v546_v7 = vld [vmem:[%s742_s0 + $0x8] sm:$0xff]   ;;  %v251_v9 = vld [vmem:[%s743_s2 + $0x10] sm:$0xff] }
   0x3   :  { %509 = vmatpush3.bf16.msra.mxu0 %v118_v3  ;;  %533 = vmatpush3.bf16.msra.mxu1 %v118_v3  ;;  %v545_v6 = vld [vmem:[%s742_s0 + $0x20] sm:$0xff]   ;;  %v547_v8 = vld [vmem:[%s742_s0 + $0x28] sm:$0xff]   ;;  %v548_v10 = vld [vmem:[%s742_s0 + $0x10] sm:$0xff]  }
   0x4   :  { %510 = vmatprep.subr.bf16.mxu0 %v542_v1  ;;  %531 = vmatprep.subr.bf16.mxu1 %v542_v1  ;;  %v549_v11 = vld [vmem:[%s742_s0 + $0x30] sm:$0xff]   ;;  %v249_v12 = vld [vmem:[%s743_s2] sm:$0xff]  ;;  %v252_v13 = vld [vmem:[%s743_s2 + $0x18] sm:$0xff] }
   0x5   :  { %514 = vmatprep.mubr.msk.bf16.mxu0 %vm91_vm1, %v544_v5  ;;  %522 = vmatprep.mubr.msk.bf16.mxu1 %vm91_vm1, %v545_v6  ;;  %v250_v14 = vld [vmem:[%s743_s2 + $0x8] sm:$0xff]  ;;  %v253_v16 = vld [vmem:[%s743_s2 + $0x20] sm:$0xff]  ;;  %v550_v17 = vld [vmem:[%s742_s0 + $0x18] sm:$0xff]  }
   0x6   :  { %277 = vperm.xlu1 %540, %v251_v9   ;;  %267 = vperm.xlu0 %539, %v249_v12   ;;  %v254_v15 = vld [vmem:[%s743_s2 + $0x28] sm:$0xff]  ;;  %v551_v18 = vld [vmem:[%s742_s0 + $0x38] sm:$0xff]   ;;  %v255_v20 = vld [vmem:[%s743_s2 + $0x30] sm:$0xff] }
   0x7   :  { %511 = vmatpush3.bf16.msra.mxu0 %v542_v1  ;;  %534 = vmatpush3.bf16.msra.mxu1 %v542_v1  ;;  %v256_v19 = vld [vmem:[%s743_s2 + $0x38] sm:$0xff]  ;;  %v258_v21 = vld [vmem:[%s743_s2 + $0x48] sm:$0xff]  ;;  %v257_v22 = vld [vmem:[%s743_s2 + $0x40] sm:$0xff] }
   0x8   :  { %512 = vmatprep.subr.bf16.mxu0 %v543_v4  ;;  %532 = vmatprep.subr.bf16.mxu1 %v543_v4  ;;  %v260_v23 = vld [vmem:[%s743_s2 + $0x58] sm:$0xff]  ;;  %v259_v24 = vld [vmem:[%s743_s2 + $0x50] sm:$0xff]  ;;  %v262_v25 = vld [vmem:[%s743_s2 + $0x68] sm:$0xff] }
   0x9   :  { %v261_v26 = vld [vmem:[%s743_s2 + $0x60] sm:$0xff]  ;;  %v264_v27 = vld [vmem:[%s743_s2 + $0x78] sm:$0xff]  ;;  %v263_v28 = vld [vmem:[%s743_s2 + $0x70] sm:$0xff] }
   0xa   :  { %282 = vperm.xlu1 %540, %v252_v13   ;;  %272 = vperm.xlu0 %539, %v250_v14  }
   0xb   :  { %513 = vmatpush3.bf16.msra.mxu0 %v543_v4  ;;  %535 = vmatpush3.bf16.msra.mxu1 %v543_v4 }
   0xe   :  { %515 = vmatmul.mubr.msk.bf16.vlgmr.msra.gmra.mxu0 %vm91_vm1, %v546_v7  ;;  %523 = vmatmul.mubr.msk.bf16.vlgmr.msra.gmra.mxu1 %vm91_vm1, %v547_v8 }
   0xf   :  { %518 = vmatprep.mubr.msk.bf16.mxu0 %vm91_vm1, %v548_v10  ;;  %526 = vmatprep.mubr.msk.bf16.mxu1 %vm91_vm1, %v549_v11 }
  0x10   :  { %292 = vperm.xlu1 %540, %v254_v15   ;;  %287 = vperm.xlu0 %539, %v253_v16  }
  0x14   :  { %302 = vperm.xlu1 %540, %v256_v19   ;;  %297 = vperm.xlu0 %539, %v255_v20  }
  0x16   :  { %519 = vmatmul.mubr.msk.bf16.gmra.mxu0 %vm91_vm1, %v550_v17  ;;  %527 = vmatmul.mubr.msk.bf16.gmra.mxu1 %vm91_vm1, %v551_v18 }
  0x18   :  { %312 = vperm.xlu1 %540, %v258_v21   ;;  %307 = vperm.xlu0 %539, %v257_v22  }
  0x1c   :  { %322 = vperm.xlu1 %540, %v260_v23   ;;  %317 = vperm.xlu0 %539, %v259_v24  }
  0x20   :  { %332 = vperm.xlu1 %540, %v262_v25   ;;  %327 = vperm.xlu0 %539, %v261_v26  }
  0x24   :  { %342 = vperm.xlu1 %540, %v264_v27   ;;  %337 = vperm.xlu0 %539, %v263_v28  }
  0x81   :  { %v268_v29 = vpop.permute.xlu0 %267  ;;  %v278_v30 = vpop.permute.xlu1 %277 }
  0x85   :  { %v662_v31 = vpop.permute.xlu0 %272  ;;  %v283_v32 = vpop.permute.xlu1 %282 }
  0x8b   :  { %v664_v33 = vpop.permute.xlu0 %287  ;;  %v666_v34 = vpop.permute.xlu1 %292 }
  0x8f   :  { %v668_v35 = vpop.permute.xlu0 %297  ;;  %v670_v36 = vpop.permute.xlu1 %302 }
  0x93   :  { %v308_v37 = vpop.permute.xlu0 %307  ;;  %v313_v38 = vpop.permute.xlu1 %312 }
  0x97   :  { %v318_v39 = vpop.permute.xlu0 %317  ;;  %v323_v52 = vpop.permute.xlu1 %322 }
  0x9b   :  { %v328_v53 = vpop.permute.xlu0 %327  ;;  %v333_v18 = vpop.permute.xlu1 %332 }
  0x9f   :  { %v338_v19 = vpop.permute.xlu0 %337 }
  0xce   :  { %v516_v40 = vpop.f32.mrf.mxu0  ;;  %v524_v41 = vpop.f32.mrf.mxu1 }
  0xcf   :  { %v219_v42 = vmax.f32 %v516_v40, 0.0  ;;  %v227_v43 = vmax.f32 %v524_v41, 0.0 }
  0xd0   :  { %v154_v44 = vpop.f32.mrf.mxu0  ;;  %v186_v45 = vpop.f32.mrf.mxu1 }
  0xd1   :  { %v235_v46 = vmin.f32 %v219_v42, 20.0  ;;  %v243_v47 = vmin.f32 %v227_v43, 20.0  ;;  %v217_v48 = vmax.f32 %v154_v44, 0.0  ;;  %v225_v49 = vmax.f32 %v186_v45, 0.0 }
  0xd2   :  { %v517_v50 = vpop.f32.mrf.mxu0  ;;  %v525_v51 = vpop.f32.mrf.mxu1 }
  0xd3   :  { %v347_v54 = vmul.f32 %v278_v30, %v235_v46  ;;  %v355_v55 = vmul.f32 %v318_v39, %v243_v47  ;;  %v233_v56 = vmin.f32 %v217_v48, 20.0  ;;  %v241_v57 = vmin.f32 %v225_v49, 20.0 }
  0xd4   :  { %v220_v58 = vmax.f32 %v517_v50, 0.0  ;;  %v228_v59 = vmax.f32 %v525_v51, 0.0  ;;  %v157_v60 = vpop.f32.mrf.mxu0  ;;  %v189_v61 = vpop.f32.mrf.mxu1 }
  0xd5   :  { %v483_v62 = vpack.c.bf16 %v347_v54, %v347_v54  ;;  %v491_v63 = vpack.c.bf16 %v355_v55, %v355_v55  ;;  %v345_v0 = vmul.f32 %v268_v29, %v233_v56  ;;  %v353_v1 = vmul.f32 %v308_v37, %v241_v57  ;;  %v343_v51 = vpop.permute.xlu1 %342 }
  0xd6   :  { %v236_v2 = vmin.f32 %v220_v58, 20.0  ;;  %v244_v3 = vmin.f32 %v228_v59, 20.0  ;;  %v218_v4 = vmax.f32 %v157_v60, 0.0  ;;  %v226_v5 = vmax.f32 %v189_v61, 0.0  ;;  %v520_v6 = vpop.f32.mrf.mxu0  ;;  %v528_v7 = vpop.f32.mrf.mxu1 }
  0xd7   :  { %428 = vst.msk [vmem:[%s744_s3 + $0x8] sm:$0xf] %vm425_vm2, %v483_v62  ;;  %436 = vst.msk [vmem:[%s744_s3 + $0x28] sm:$0xf] %vm425_vm2, %v491_v63  ;;  %v481_v8 = vpack.c.bf16 %v345_v0, %v345_v0  ;;  %v489_v9 = vpack.c.bf16 %v353_v1, %v353_v1  ;;  %v223_v10 = vmax.f32 %v520_v6, 0.0  ;;  %v231_v11 = vmax.f32 %v528_v7, 0.0 }
  0xd8   :  { %v348_v12 = vmul.f32 %v283_v32, %v236_v2  ;;  %v356_v13 = vmul.f32 %v323_v52, %v244_v3  ;;  %v234_v14 = vmin.f32 %v218_v4, 20.0  ;;  %v242_v15 = vmin.f32 %v226_v5, 20.0  ;;  %v170_v16 = vpop.f32.mrf.mxu0  ;;  %v202_v17 = vpop.f32.mrf.mxu1 }
  0xd9   :  { %426 = vst.msk [vmem:[%s744_s3] sm:$0xf] %vm425_vm2, %v481_v8  ;;  %434 = vst.msk [vmem:[%s744_s3 + $0x20] sm:$0xf] %vm425_vm2, %v489_v9  ;;  %v239_v20 = vmin.f32 %v223_v10, 20.0  ;;  %v247_v21 = vmin.f32 %v231_v11, 20.0 }
  0xda   :  { %v221_v22 = vmax.f32 %v170_v16, 0.0  ;;  %v229_v23 = vmax.f32 %v202_v17, 0.0  ;;  %v484_v24 = vpack.c.bf16 %v348_v12, %v348_v12  ;;  %v492_v25 = vpack.c.bf16 %v356_v13, %v356_v13  ;;  %v521_v28 = vpop.f32.mrf.mxu0  ;;  %v529_v29 = vpop.f32.mrf.mxu1 }
  0xdb   :  { %v346_v26 = vmul.f32 %v662_v31, %v234_v14  ;;  %v354_v27 = vmul.f32 %v313_v38, %v242_v15  ;;  %v351_v30 = vmul.f32 %v668_v35, %v239_v20  ;;  %v359_v32 = vmul.f32 %v338_v19, %v247_v21 }
  0xdc   :  { %v237_v37 = vmin.f32 %v221_v22, 20.0  ;;  %v245_v39 = vmin.f32 %v229_v23, 20.0  ;;  %429 = vst.msk [vmem:[%s744_s3 + $0xc] sm:$0xf] %vm425_vm2, %v484_v24  ;;  %437 = vst.msk [vmem:[%s744_s3 + $0x2c] sm:$0xf] %vm425_vm2, %v492_v25  ;;  %v173_v42 = vpop.f32.mrf.mxu0  ;;  %v205_v43 = vpop.f32.mrf.mxu1 }
  0xdd   :  { %v482_v40 = vpack.c.bf16 %v346_v26, %v346_v26  ;;  %v490_v31 = vpack.c.bf16 %v354_v27, %v354_v27  ;;  %v224_v38 = vmax.f32 %v521_v28, 0.0  ;;  %v232_v41 = vmax.f32 %v529_v29, 0.0 }
  0xde   :  { %v487_v35 = vpack.c.bf16 %v351_v30, %v351_v30  ;;  %v495_v44 = vpack.c.bf16 %v359_v32, %v359_v32  ;;  %v349_v45 = vmul.f32 %v664_v33, %v237_v37  ;;  %v357_v46 = vmul.f32 %v328_v53, %v245_v39 }
  0xdf   :  { %427 = vst.msk [vmem:[%s744_s3 + $0x4] sm:$0xf] %vm425_vm2, %v482_v40  ;;  %435 = vst.msk [vmem:[%s744_s3 + $0x24] sm:$0xf] %vm425_vm2, %v490_v31  ;;  %v240_v47 = vmin.f32 %v224_v38, 20.0  ;;  %v248_v48 = vmin.f32 %v232_v41, 20.0 }
  0xe0   :  { %v222_v49 = vmax.f32 %v173_v42, 0.0  ;;  %v230_v50 = vmax.f32 %v205_v43, 0.0  ;;  %432 = vst.msk [vmem:[%s744_s3 + $0x18] sm:$0xf] %vm425_vm2, %v487_v35  ;;  %440 = vst.msk [vmem:[%s744_s3 + $0x38] sm:$0xf] %vm425_vm2, %v495_v44  ;;  %v485_v33 = vpack.c.bf16 %v349_v45, %v349_v45  ;;  %v493_v52 = vpack.c.bf16 %v357_v46, %v357_v46 }
  0xe1   :  { %v352_v53 = vmul.f32 %v670_v36, %v240_v47  ;;  %v360_v54 = vmul.f32 %v343_v51, %v248_v48 }
  0xe2   :  { %v238_v55 = vmin.f32 %v222_v49, 20.0  ;;  %v246_v56 = vmin.f32 %v230_v50, 20.0  ;;  %430 = vst.msk [vmem:[%s744_s3 + $0x10] sm:$0xf] %vm425_vm2, %v485_v33  ;;  %438 = vst.msk [vmem:[%s744_s3 + $0x30] sm:$0xf] %vm425_vm2, %v493_v52 }
  0xe3   :  { %v488_v57 = vpack.c.bf16 %v352_v53, %v352_v53  ;;  %v496_v58 = vpack.c.bf16 %v360_v54, %v360_v54 }
  0xe4   :  { %v350_v59 = vmul.f32 %v666_v34, %v238_v55  ;;  %v358_v60 = vmul.f32 %v333_v18, %v246_v56 }
  0xe5   :  { %433 = vst.msk [vmem:[%s744_s3 + $0x1c] sm:$0xf] %vm425_vm2, %v488_v57  ;;  %441 = vst.msk [vmem:[%s744_s3 + $0x3c] sm:$0xf] %vm425_vm2, %v496_v58 }
  0xe6   :  { %v486_v36 = vpack.c.bf16 %v350_v59, %v350_v59  ;;  %v494_v61 = vpack.c.bf16 %v358_v60, %v358_v60 }
  0xe8   :  { %431 = vst.msk [vmem:[%s744_s3 + $0x14] sm:$0xf] %vm425_vm2, %v486_v36  ;;  %439 = vst.msk [vmem:[%s744_s3 + $0x34] sm:$0xf] %vm425_vm2, %v494_v61 }

// kernel: _lambda_.2
= control target key start
LH: loop header
LB: loop body
LE: loop exit
PB: predicated region body
PF: predicated region fallthrough
CT: control target
= control target key end

     0   :  { %vm103_vm0 = vcmask 1043456   ;;  %vm104_vm1 = vcmask 1044480   ;;  %vm78_vm2 = vcmask 72704   ;;  %v527_v1 = vmov 65535   ;;  %s711_s1 = inlined_call_operand.vmem [shape: bf16[9,4], index: 1, kind: input, shape index: {}]   ;;  %s712_s0 = inlined_call_operand.vmem [shape: bf16[128,9], index: 0, kind: input, shape index: {}]   ;;  %s713_s2 = inlined_call_operand.vmem [shape: f32[128,1], index: 2, kind: input, shape index: {}]   ;;  %s714_s3 = inlined_call_operand.vmem [shape: bf16[128,4], index: 3, kind: output, shape index: {}]  }
   0x1   :  { %v518_v0 = vld [vmem:[%s711_s1] sm:$0x1f]   ;;  %v105_v2 = vsel %vm103_vm0, 4294967295, %v527_v1  ;;  %v521_v7 = vld [vmem:[%s712_s0 + $0x8] sm:$0xff]   ;;  %v528_v9 = vmov 0   ;;  %v523_v10 = vld [vmem:[%s712_s0 + $0x10] sm:$0xff]  }
   0x2   :  { %v519_v3 = vld [vmem:[%s712_s0] sm:$0xff]   ;;  %v106_v4 = vsel %vm104_vm1, %v105_v2, 0  ;;  %v522_v8 = vld [vmem:[%s712_s0 + $0x28] sm:$0xff]   ;;  %517 = vset.pattern.permute.xlu1 %v528_v9  ;;  %v524_v11 = vld [vmem:[%s712_s0 + $0x30] sm:$0xff]   ;;  %516 = vset.pattern.permute.xlu0 %v528_v9  ;;  %vm415_vm3 = vcmask 27648  }
   0x3   :  { %v520_v5 = vld [vmem:[%s712_s0 + $0x20] sm:$0xff]   ;;  %v108_v6 = vand.u32 %v518_v0, %v106_v4  ;;  %496 = vmatprep.mubr.msk.bf16.mxu0 %vm78_vm2, %v519_v3  ;;  %v241_v12 = vld [vmem:[%s713_s2 + $0x10] sm:$0xff]  ;;  %v242_v14 = vld [vmem:[%s713_s2 + $0x18] sm:$0xff] }
   0x4   :  { %504 = vmatprep.mubr.msk.bf16.mxu1 %vm78_vm2, %v520_v5  ;;  %v239_v13 = vld [vmem:[%s713_s2] sm:$0xff]  ;;  %267 = vperm.xlu1 %517, %v241_v12   ;;  %v240_v15 = vld [vmem:[%s713_s2 + $0x8] sm:$0xff]  ;;  %v525_v16 = vld [vmem:[%s712_s0 + $0x18] sm:$0xff]  }
   0x5   :  { %494 = vmatprep.subr.bf16.mxu0 %v108_v6  ;;  %512 = vmatprep.subr.bf16.mxu1 %v108_v6  ;;  %v526_v17 = vld [vmem:[%s712_s0 + $0x38] sm:$0xff]   ;;  %v244_v18 = vld [vmem:[%s713_s2 + $0x28] sm:$0xff]  ;;  %v243_v19 = vld [vmem:[%s713_s2 + $0x20] sm:$0xff] }
   0x6   :  { %495 = vmatpush3.bf16.msra.mxu0 %v108_v6  ;;  %513 = vmatpush3.bf16.msra.mxu1 %v108_v6  ;;  %v246_v20 = vld [vmem:[%s713_s2 + $0x38] sm:$0xff]  ;;  %v245_v21 = vld [vmem:[%s713_s2 + $0x30] sm:$0xff]  ;;  %v248_v22 = vld [vmem:[%s713_s2 + $0x48] sm:$0xff] }
   0x7   :  { %257 = vperm.xlu0 %516, %v239_v13   ;;  %v247_v23 = vld [vmem:[%s713_s2 + $0x40] sm:$0xff]  ;;  %v250_v24 = vld [vmem:[%s713_s2 + $0x58] sm:$0xff]  ;;  %v249_v25 = vld [vmem:[%s713_s2 + $0x50] sm:$0xff] }
   0x8   :  { %272 = vperm.xlu1 %517, %v242_v14   ;;  %v252_v26 = vld [vmem:[%s713_s2 + $0x68] sm:$0xff]  ;;  %v251_v27 = vld [vmem:[%s713_s2 + $0x60] sm:$0xff]  ;;  %v254_v28 = vld [vmem:[%s713_s2 + $0x78] sm:$0xff] }
   0x9   :  { %497 = vmatmul.mubr.msk.bf16.vlgmr.msra.gmra.mxu0 %vm78_vm2, %v521_v7  ;;  %505 = vmatmul.mubr.msk.bf16.vlgmr.msra.gmra.mxu1 %vm78_vm2, %v522_v8  ;;  %v253_v29 = vld [vmem:[%s713_s2 + $0x70] sm:$0xff] }
   0xa   :  { %500 = vmatprep.mubr.msk.bf16.mxu0 %vm78_vm2, %v523_v10  ;;  %508 = vmatprep.mubr.msk.bf16.mxu1 %vm78_vm2, %v524_v11 }
   0xb   :  { %262 = vperm.xlu0 %516, %v240_v15  }
   0xc   :  { %282 = vperm.xlu1 %517, %v244_v18  }
   0xf   :  { %277 = vperm.xlu0 %516, %v243_v19  }
  0x10   :  { %292 = vperm.xlu1 %517, %v246_v20  }
  0x11   :  { %501 = vmatmul.mubr.msk.bf16.gmra.mxu0 %vm78_vm2, %v525_v16  ;;  %509 = vmatmul.mubr.msk.bf16.gmra.mxu1 %vm78_vm2, %v526_v17 }
  0x13   :  { %287 = vperm.xlu0 %516, %v245_v21  }
  0x14   :  { %302 = vperm.xlu1 %517, %v248_v22  }
  0x17   :  { %297 = vperm.xlu0 %516, %v247_v23  }
  0x18   :  { %312 = vperm.xlu1 %517, %v250_v24  }
  0x1b   :  { %307 = vperm.xlu0 %516, %v249_v25  }
  0x1c   :  { %322 = vperm.xlu1 %517, %v252_v26  }
  0x1f   :  { %317 = vperm.xlu0 %516, %v251_v27  }
  0x20   :  { %332 = vperm.xlu1 %517, %v254_v28  }
  0x23   :  { %327 = vperm.xlu0 %516, %v253_v29  }
  0x7f   :  { %v268_v31 = vpop.permute.xlu1 %267 }
  0x82   :  { %v258_v30 = vpop.permute.xlu0 %257 }
  0x83   :  { %v273_v33 = vpop.permute.xlu1 %272 }
  0x86   :  { %v632_v32 = vpop.permute.xlu0 %262 }
  0x87   :  { %v636_v35 = vpop.permute.xlu1 %282 }
  0x8a   :  { %v634_v34 = vpop.permute.xlu0 %277 }
  0x8b   :  { %v640_v37 = vpop.permute.xlu1 %292 }
  0x8e   :  { %v638_v36 = vpop.permute.xlu0 %287 }
  0x8f   :  { %v303_v39 = vpop.permute.xlu1 %302 }
  0x92   :  { %v298_v38 = vpop.permute.xlu0 %297 }
  0x93   :  { %v313_v53 = vpop.permute.xlu1 %312 }
  0x96   :  { %v308_v40 = vpop.permute.xlu0 %307 }
  0x97   :  { %v323_v19 = vpop.permute.xlu1 %322 }
  0x9a   :  { %v318_v54 = vpop.permute.xlu0 %317 }
  0x9e   :  { %v328_v20 = vpop.permute.xlu0 %327 }
  0xc9   :  { %v498_v41 = vpop.f32.mrf.mxu0  ;;  %v506_v42 = vpop.f32.mrf.mxu1 }
  0xca   :  { %v209_v43 = vmax.f32 %v498_v41, 0.0  ;;  %v217_v44 = vmax.f32 %v506_v42, 0.0 }
  0xcb   :  { %v144_v45 = vpop.f32.mrf.mxu0  ;;  %v176_v46 = vpop.f32.mrf.mxu1 }
  0xcc   :  { %v225_v47 = vmin.f32 %v209_v43, 20.0  ;;  %v233_v48 = vmin.f32 %v217_v44, 20.0  ;;  %v207_v49 = vmax.f32 %v144_v45, 0.0  ;;  %v215_v50 = vmax.f32 %v176_v46, 0.0 }
  0xcd   :  { %v499_v51 = vpop.f32.mrf.mxu0  ;;  %v507_v52 = vpop.f32.mrf.mxu1 }
  0xce   :  { %v337_v55 = vmul.f32 %v268_v31, %v225_v47  ;;  %v345_v56 = vmul.f32 %v308_v40, %v233_v48  ;;  %v223_v57 = vmin.f32 %v207_v49, 20.0  ;;  %v231_v58 = vmin.f32 %v215_v50, 20.0 }
  0xcf   :  { %v210_v59 = vmax.f32 %v499_v51, 0.0  ;;  %v218_v60 = vmax.f32 %v507_v52, 0.0  ;;  %v147_v61 = vpop.f32.mrf.mxu0  ;;  %v179_v62 = vpop.f32.mrf.mxu1 }
  0xd0   :  { %v471_v63 = vpack.c.bf16 %v337_v55, %v337_v55  ;;  %v479_v0 = vpack.c.bf16 %v345_v56, %v345_v56  ;;  %v335_v1 = vmul.f32 %v258_v30, %v223_v57  ;;  %v343_v2 = vmul.f32 %v298_v38, %v231_v58  ;;  %v333_v52 = vpop.permute.xlu1 %332 }
  0xd1   :  { %v226_v3 = vmin.f32 %v210_v59, 20.0  ;;  %v234_v4 = vmin.f32 %v218_v60, 20.0  ;;  %v208_v5 = vmax.f32 %v147_v61, 0.0  ;;  %v216_v6 = vmax.f32 %v179_v62, 0.0  ;;  %v502_v7 = vpop.f32.mrf.mxu0  ;;  %v510_v8 = vpop.f32.mrf.mxu1 }
  0xd2   :  { %418 = vst.msk [vmem:[%s714_s3 + $0x8] sm:$0xf] %vm415_vm3, %v471_v63  ;;  %426 = vst.msk [vmem:[%s714_s3 + $0x28] sm:$0xf] %vm415_vm3, %v479_v0  ;;  %v469_v9 = vpack.c.bf16 %v335_v1, %v335_v1  ;;  %v477_v10 = vpack.c.bf16 %v343_v2, %v343_v2  ;;  %v213_v11 = vmax.f32 %v502_v7, 0.0  ;;  %v221_v12 = vmax.f32 %v510_v8, 0.0 }
  0xd3   :  { %v338_v13 = vmul.f32 %v273_v33, %v226_v3  ;;  %v346_v14 = vmul.f32 %v313_v53, %v234_v4  ;;  %v224_v15 = vmin.f32 %v208_v5, 20.0  ;;  %v232_v16 = vmin.f32 %v216_v6, 20.0  ;;  %v160_v17 = vpop.f32.mrf.mxu0  ;;  %v192_v18 = vpop.f32.mrf.mxu1 }
  0xd4   :  { %416 = vst.msk [vmem:[%s714_s3] sm:$0xf] %vm415_vm3, %v469_v9  ;;  %424 = vst.msk [vmem:[%s714_s3 + $0x20] sm:$0xf] %vm415_vm3, %v477_v10  ;;  %v229_v21 = vmin.f32 %v213_v11, 20.0  ;;  %v237_v22 = vmin.f32 %v221_v12, 20.0 }
  0xd5   :  { %v211_v23 = vmax.f32 %v160_v17, 0.0  ;;  %v219_v24 = vmax.f32 %v192_v18, 0.0  ;;  %v472_v25 = vpack.c.bf16 %v338_v13, %v338_v13  ;;  %v480_v26 = vpack.c.bf16 %v346_v14, %v346_v14  ;;  %v503_v29 = vpop.f32.mrf.mxu0  ;;  %v511_v30 = vpop.f32.mrf.mxu1 }
  0xd6   :  { %v336_v27 = vmul.f32 %v632_v32, %v224_v15  ;;  %v344_v28 = vmul.f32 %v303_v39, %v232_v16  ;;  %v341_v31 = vmul.f32 %v638_v36, %v229_v21  ;;  %v349_v33 = vmul.f32 %v328_v20, %v237_v22 }
  0xd7   :  { %v227_v38 = vmin.f32 %v211_v23, 20.0  ;;  %v235_v40 = vmin.f32 %v219_v24, 20.0  ;;  %419 = vst.msk [vmem:[%s714_s3 + $0xc] sm:$0xf] %vm415_vm3, %v472_v25  ;;  %427 = vst.msk [vmem:[%s714_s3 + $0x2c] sm:$0xf] %vm415_vm3, %v480_v26  ;;  %v163_v43 = vpop.f32.mrf.mxu0  ;;  %v195_v44 = vpop.f32.mrf.mxu1 }
  0xd8   :  { %v470_v41 = vpack.c.bf16 %v336_v27, %v336_v27  ;;  %v478_v32 = vpack.c.bf16 %v344_v28, %v344_v28  ;;  %v214_v39 = vmax.f32 %v503_v29, 0.0  ;;  %v222_v42 = vmax.f32 %v511_v30, 0.0 }
  0xd9   :  { %v475_v36 = vpack.c.bf16 %v341_v31, %v341_v31  ;;  %v483_v45 = vpack.c.bf16 %v349_v33, %v349_v33  ;;  %v339_v46 = vmul.f32 %v634_v34, %v227_v38  ;;  %v347_v47 = vmul.f32 %v318_v54, %v235_v40 }
  0xda   :  { %417 = vst.msk [vmem:[%s714_s3 + $0x4] sm:$0xf] %vm415_vm3, %v470_v41  ;;  %425 = vst.msk [vmem:[%s714_s3 + $0x24] sm:$0xf] %vm415_vm3, %v478_v32  ;;  %v230_v48 = vmin.f32 %v214_v39, 20.0  ;;  %v238_v49 = vmin.f32 %v222_v42, 20.0 }
  0xdb   :  { %v212_v50 = vmax.f32 %v163_v43, 0.0  ;;  %v220_v51 = vmax.f32 %v195_v44, 0.0  ;;  %422 = vst.msk [vmem:[%s714_s3 + $0x18] sm:$0xf] %vm415_vm3, %v475_v36  ;;  %430 = vst.msk [vmem:[%s714_s3 + $0x38] sm:$0xf] %vm415_vm3, %v483_v45  ;;  %v473_v34 = vpack.c.bf16 %v339_v46, %v339_v46  ;;  %v481_v53 = vpack.c.bf16 %v347_v47, %v347_v47 }
  0xdc   :  { %v342_v54 = vmul.f32 %v640_v37, %v230_v48  ;;  %v350_v55 = vmul.f32 %v333_v52, %v238_v49 }
  0xdd   :  { %v228_v56 = vmin.f32 %v212_v50, 20.0  ;;  %v236_v57 = vmin.f32 %v220_v51, 20.0  ;;  %420 = vst.msk [vmem:[%s714_s3 + $0x10] sm:$0xf] %vm415_vm3, %v473_v34  ;;  %428 = vst.msk [vmem:[%s714_s3 + $0x30] sm:$0xf] %vm415_vm3, %v481_v53 }
  0xde   :  { %v476_v58 = vpack.c.bf16 %v342_v54, %v342_v54  ;;  %v484_v59 = vpack.c.bf16 %v350_v55, %v350_v55 }
  0xdf   :  { %v340_v60 = vmul.f32 %v636_v35, %v228_v56  ;;  %v348_v61 = vmul.f32 %v323_v19, %v236_v57 }
  0xe0   :  { %423 = vst.msk [vmem:[%s714_s3 + $0x1c] sm:$0xf] %vm415_vm3, %v476_v58  ;;  %431 = vst.msk [vmem:[%s714_s3 + $0x3c] sm:$0xf] %vm415_vm3, %v484_v59 }
  0xe1   :  { %v474_v37 = vpack.c.bf16 %v340_v60, %v340_v60  ;;  %v482_v62 = vpack.c.bf16 %v348_v61, %v348_v61 }
  0xe3   :  { %421 = vst.msk [vmem:[%s714_s3 + $0x14] sm:$0xf] %vm415_vm3, %v474_v37  ;;  %429 = vst.msk [vmem:[%s714_s3 + $0x34] sm:$0xf] %vm415_vm3, %v482_v62 }

</bundles_post_ra>
